<compile_context>
chip_gen: v7x
topology: tpu7x:2x2x1
jax: 0.10.0
libtpu: 0.0.40
codegen_flags: <defaults>
</compile_context>

<pallas_src>
import jax
import jax.numpy as jnp
from jax import lax
from jax.experimental import pallas as pl
from jax.experimental.pallas import tpu as pltpu


def _conv2x2_matmul_kernel(x_ref, w_ref, b_ref, o_ref):
    # x_ref: (tm, K) rows of flattened 2x2 patches
    # w_ref: (K, OC)   b_ref: (1, OC)   o_ref: (tm, OC)
    acc = jnp.dot(x_ref[...], w_ref[...], preferred_element_type=jnp.float32)
    o_ref[...] = (acc + b_ref[...].astype(jnp.float32)).astype(o_ref.dtype)


def downsample_conv2x2(x, w, b, *, tm=512):
    """Forward pass of DownSample: Conv2d(C -> OC, kernel 2, stride 2, padding 0).

    x: (N, C, H, W) NCHW (PyTorch layout), w: (OC, C, 2, 2), b: (OC,)
    returns (N, OC, H//2, W//2)
    """
    N, C, H, W = x.shape
    OC = w.shape[0]
    assert w.shape == (OC, C, 2, 2)
    assert H % 2 == 0 and W % 2 == 0, "2x2 / stride-2 conv needs even H, W"
    Ho, Wo = H // 2, W // 2
    K = C * 4
    M = N * Ho * Wo

    # im2col for non-overlapping 2x2 windows (pure layout plumbing):
    # (N, C, H, W) -> (N, C, Ho, 2, Wo, 2) -> (N, Ho, Wo, C, 2, 2) -> (M, K)
    patches = x.reshape(N, C, Ho, 2, Wo, 2).transpose(0, 2, 4, 1, 3, 5).reshape(M, K)
    # (OC, C, 2, 2) -> (C, 2, 2, OC) -> (K, OC): output channels on the lane axis.
    w_mat = w.transpose(1, 2, 3, 0).reshape(K, OC)
    b_mat = b.reshape(1, OC)

    # One grid axis over M with large, sublane-aligned blocks.
    tm = max(8, min(tm, -(-M // 8) * 8))
    M_pad = -(-M // tm) * tm
    if M_pad != M:
        patches = jnp.pad(patches, ((0, M_pad - M), (0, 0)))

    out_pad = pl.pallas_call(
        _conv2x2_matmul_kernel,
        out_shape=jax.ShapeDtypeStruct((M_pad, OC), x.dtype),
        grid=(M_pad // tm,),
        in_specs=[
            pl.BlockSpec((tm, K), lambda i: (i, 0)),     # patch rows, tiled over M
            pl.BlockSpec((K, OC), lambda i: (0, 0)),     # weights, resident
            pl.BlockSpec((1, OC), lambda i: (0, 0)),     # bias, resident
        ],
        out_specs=pl.BlockSpec((tm, OC), lambda i: (i, 0)),
        compiler_params=pltpu.CompilerParams(
            dimension_semantics=("parallel",),
            vmem_limit_bytes=64 * 1024 * 1024,
        ),
    )(patches, w_mat, b_mat)

    # (M, OC) -> (N, Ho, Wo, OC) -> NCHW to match PyTorch output layout.
    return out_pad[:M].reshape(N, Ho, Wo, OC).transpose(0, 3, 1, 2)


def _reference_downsample(x, w, b):
    y = lax.conv_general_dilated(
        x, w, window_strides=(2, 2), padding="VALID",
        dimension_numbers=("NCHW", "OIHW", "NCHW"))
    return y + b.reshape(1, -1, 1, 1)


if __name__ == "__main__":
    key = jax.random.PRNGKey(0)
    kx, kw, kb = jax.random.split(key, 3)
    N, in_ch, out_ch, H, W = 2, 4, 8, 16, 16
    x = jax.random.normal(kx, (N, in_ch, H, W), dtype=jnp.float32)
    w = jax.random.normal(kw, (out_ch, in_ch, 2, 2), dtype=jnp.float32) * 0.1
    b = jax.random.normal(kb, (out_ch,), dtype=jnp.float32) * 0.1

    out = downsample_conv2x2(x, w, b)
    out = jax.block_until_ready(out)

    ref = _reference_downsample(x, w, b)
    assert out.shape == (N, out_ch, H // 2, W // 2), out.shape
    assert out.dtype == x.dtype
    assert jnp.allclose(out, ref, atol=1e-5, rtol=1e-5), float(
        jnp.max(jnp.abs(out - ref)))

    print("KERNEL_OK")
</pallas_src>

<mosaic_0001>
module attributes {stable_mosaic.version = 11 : i64} {
  func.func @_conv2x2_matmul_kernel(%arg0: i32, %arg1: memref<128x16xf32, #tpu.memory_space<vmem>>, %arg2: memref<16x8xf32, #tpu.memory_space<vmem>>, %arg3: memref<1x8xf32, #tpu.memory_space<vmem>>, %arg4: memref<128x8xf32, #tpu.memory_space<vmem>>) attributes {dimension_semantics = [#tpu.dimension_semantics<parallel>], iteration_bounds = array<i64: 1>, scalar_prefetch = 0 : i64, scratch_operands = 0 : i64, tpu.core_type = #tpu.core_type<tc>, window_params = [{transform_indices = @transform_0, window_bounds = array<i64: 128, 16>}, {pipeline_mode = #tpu.pipeline_mode<synchronous>, transform_indices = @transform_1, window_bounds = array<i64: 16, 8>}, {pipeline_mode = #tpu.pipeline_mode<synchronous>, transform_indices = @transform_2, window_bounds = array<i64: 1, 8>}, {transform_indices = @transform_3, window_bounds = array<i64: 128, 8>}]} {
    %c0 = arith.constant 0 : index
    %c0_0 = arith.constant 0 : index
    %0 = vector.load %arg1[%c0, %c0_0] : memref<128x16xf32, #tpu.memory_space<vmem>>, vector<128x16xf32>
    %c0_1 = arith.constant 0 : index
    %c0_2 = arith.constant 0 : index
    %1 = vector.load %arg2[%c0_1, %c0_2] : memref<16x8xf32, #tpu.memory_space<vmem>>, vector<16x8xf32>
    %cst = arith.constant dense<0.000000e+00> : vector<128x8xf32>
    %2 = tpu.matmul %0, %1, %cst {dimension_numbers = #tpu.dot_dimension_numbers<[1], [0], [0], [1], [0, 0, 1, 1], [], []>} : vector<128x16xf32>, vector<16x8xf32>, vector<128x8xf32> -> vector<128x8xf32>
    %c0_3 = arith.constant 0 : index
    %c0_4 = arith.constant 0 : index
    %3 = vector.load %arg3[%c0_3, %c0_4] : memref<1x8xf32, #tpu.memory_space<vmem>>, vector<1x8xf32>
    %4 = vector.broadcast %3 : vector<1x8xf32> to vector<128x8xf32>
    %5 = arith.addf %2, %4 : vector<128x8xf32>
    %c0_5 = arith.constant 0 : index
    %c0_6 = arith.constant 0 : index
    %6 = vector.load %arg4[%c0_5, %c0_6] : memref<128x8xf32, #tpu.memory_space<vmem>>, vector<128x8xf32>
    tpu.vector_store %arg4[%c0_5, %c0_6], %5 {strides = array<i32>} : memref<128x8xf32, #tpu.memory_space<vmem>>, vector<128x8xf32>,
    return
  }
  func.func @transform_0(%arg0: i32) -> (i32, i32) {
    %c0_i32 = arith.constant 0 : i32
    %c0_i32_0 = arith.constant 0 : i32
    return %arg0, %c0_i32 : i32, i32
  }
  func.func @transform_1(%arg0: i32) -> (i32, i32) {
    %c0_i32 = arith.constant 0 : i32
    %c0_i32_0 = arith.constant 0 : i32
    %c0_i32_1 = arith.constant 0 : i32
    return %c0_i32, %c0_i32_0 : i32, i32
  }
  func.func @transform_2(%arg0: i32) -> (i32, i32) {
    %c0_i32 = arith.constant 0 : i32
    %c0_i32_0 = arith.constant 0 : i32
    %c0_i32_1 = arith.constant 0 : i32
    return %c0_i32, %c0_i32_0 : i32, i32
  }
  func.func @transform_3(%arg0: i32) -> (i32, i32) {
    %c0_i32 = arith.constant 0 : i32
    %c0_i32_0 = arith.constant 0 : i32
    return %arg0, %c0_i32 : i32, i32
  }
}

</mosaic_0001>

<bundles_post_ra>
// kernel: tpu_custom_call.1
= control target key start
LH: loop header
LB: loop body
LE: loop exit
PB: predicated region body
PF: predicated region fallthrough
CT: control target
= control target key end

     0   :  { %8 = vsyncpa [#allocation3], 0  ;;  %s599_s0 = inlined_call_operand.hbm [shape: f32[128,16], index: 0, kind: input, shape index: {}]   ;;  %s600_s1 = inlined_call_operand.hbm [shape: f32[16,8], index: 1, kind: input, shape index: {}]   ;;  %s601_s2 = inlined_call_operand.hbm [shape: f32[1,8], index: 2, kind: input, shape index: {}]   ;;  %s602_s3 = inlined_call_operand.hbm [shape: f32[128,8], index: 3, kind: output, shape index: {}]  }
   0x1   :  { %9 = vsyncpa [#allocation6], 0 }
   0x2   :  { %10 = vsyncpa [#allocation4], 0  ;;  %s477_s12 = smov [#allocation5]   ;;  %s478_s14 = smov [#allocation2]  }
   0x3   :  { %s28_s13 = sshll.u32 %s477_s12, 4  ;;  %s16_s15 = sshll.u32 %s478_s14, 4  ;;  %s29_s13 = int_to_ptr.vmem [resolvable:$true] %s28_s13  ;;  %s503_s15 = int_to_ptr.vmem [resolvable:$true] %s16_s15 }
   0x4   :  { %s383_s18 = scalar_lea.hbm %s600_s1, 256 }
   0x5   :  { %p384_p0 = scmp.ne.s32.totalorder %s600_s1, %s383_s18  ;;  %p387_p1 = scmp.lt.u32.totalorder %s383_s18, %s600_s1 }
   0x7   :  { %p389_p2 = pnand %p387_p1, %p384_p0 }
   0x9   :  { %392 = shalt.err (!%p389_p2)
}
   0xa   :  { %s393_s23 = scalar_lea.vmem %s29_s13, 256  ;;  %p398_p4 = scmp.lt.s32.totalorder %s29_s13, %s29_s13 }
   0xb   :  { %p394_p3 = scmp.ne.s32.totalorder %s29_s13, %s393_s23  ;;  %p399_p5 = scmp.lt.s32.totalorder %s393_s23, %s393_s23 }
   0xd   :  { %p400_p6 = por %p399_p5, %p398_p4 }
   0xf   :  { %p401_p7 = pnand %p400_p6, %p394_p3 }
  0x11   :  { %404 = shalt.err (!%p401_p7)
}
  0x12   :  { %s479_s24 = smov 128   ;;  %s480_s25 = smov 8  }
  0x13   :  { %34 = dma.hbm_to_vmem [thread:$0]  %s600_s1, 256, %s29_s13, [#allocation6], %s479_s24, %s479_s24, %s480_s25  }
  0x14   :  { %s405_s30 = scalar_lea.hbm %s599_s0, 2048 }
  0x15   :  { %p406_p8 = scmp.ne.s32.totalorder %s599_s0, %s405_s30  ;;  %p409_p9 = scmp.lt.u32.totalorder %s405_s30, %s599_s0 }
  0x17   :  { %p411_p10 = pnand %p409_p9, %p406_p8 }
  0x19   :  { %414 = shalt.err (!%p411_p10)
}
  0x1a   :  { %s415_s8 = scalar_lea.vmem %s503_s15, 2048  ;;  %p420_p12 = scmp.lt.s32.totalorder %s503_s15, %s503_s15 }
  0x1b   :  { %p416_p11 = scmp.ne.s32.totalorder %s503_s15, %s415_s8  ;;  %p421_p13 = scmp.lt.s32.totalorder %s415_s8, %s415_s8 }
  0x1d   :  { %p422_p0 = por %p421_p13, %p420_p12 }
  0x1f   :  { %p423_p1 = pnand %p422_p0, %p416_p11 }
  0x21   :  { %426 = shalt.err (!%p423_p1)
}
  0x22   :  { %22 = dma.hbm_to_vmem [thread:$0]  %s599_s0, 2048, %s503_s15, [#allocation3], %s479_s24, %s479_s24, %s480_s25  }
  0x23   :  { %s481_s10 = smov [#allocation7]   ;;  %s427_s14 = scalar_lea.hbm %s601_s2, 16 }
  0x24   :  { %s41_s11 = sshll.u32 %s481_s10, 4  ;;  %p428_p2 = scmp.ne.s32.totalorder %s601_s2, %s427_s14  ;;  %s42_s11 = int_to_ptr.vmem [resolvable:$true] %s41_s11 }
  0x25   :  { %p431_p3 = scmp.lt.u32.totalorder %s427_s14, %s601_s2 }
  0x27   :  { %p433_p4 = pnand %p431_p3, %p428_p2 }
  0x29   :  { %436 = shalt.err (!%p433_p4)
}
  0x2a   :  { %s437_s20 = scalar_lea.vmem %s42_s11, 16  ;;  %s441_s0 = scalar_lea.vmem %s42_s11, 32 }
  0x2b   :  { %p438_p5 = scmp.ne.s32.totalorder %s42_s11, %s437_s20  ;;  %p442_p6 = scmp.lt.s32.totalorder %s42_s11, %s42_s11 }
  0x2c   :  { %p443_p7 = scmp.lt.s32.totalorder %s441_s0, %s437_s20 }
  0x2e   :  { %p444_p8 = por %p443_p7, %p442_p6 }
  0x30   :  { %p445_p9 = pnand %p444_p8, %p438_p5 }
  0x32   :  { %448 = shalt.err (!%p445_p9)
}
  0x33   :  { %44 = dma.hbm_to_vmem [thread:$0]  %s601_s2, 16, %s42_s11, [#allocation6]  }
  0x34   :  { %471 = dma.done.wait [#allocation3], 2048  }
  0x35   :  { %472 = vsyncadd [#allocation3], 4294965248 }
  0x36   :  { %473 = dma.done.wait [#allocation6], 272  }
  0x37   :  { %474 = vsyncadd [#allocation6], 4294967024  ;;  %vm79_vm0 = vcmask 130048   ;;  %v70_v0 = vld [vmem:[#allocation5] sm:$0xff]  ;;  %v71_v1 = vld [vmem:[#allocation5 + $0x8] sm:$0xff]  ;;  %vm273_vm1 = vcmask 64512  }
  0x38   :  { %v54_v2 = vld [vmem:[#allocation2] sm:$0xff]  ;;  %v371_v3 = vpack.c.bf16 %v71_v1, %v70_v0  ;;  %v55_v5 = vld [vmem:[#allocation2 + $0x8] sm:$0xff]  ;;  %v56_v7 = vld [vmem:[#allocation2 + $0x10] sm:$0xff]  ;;  %s482_s2 = smov [#allocation8]  }
  0x39   :  { %347 = vmatprep.mubr.msk.f32.mxu0 %vm79_vm0, %v54_v2  ;;  %v62_v4 = vld [vmem:[#allocation2 + $0x40] sm:$0xff]  ;;  %v63_v6 = vld [vmem:[#allocation2 + $0x48] sm:$0xff]  ;;  %v64_v8 = vld [vmem:[#allocation2 + $0x50] sm:$0xff]  ;;  %s295_s22 = sshll.u32 %s482_s2, 4  ;;  %s296_s22 = int_to_ptr.vmem [resolvable:$true] %s295_s22 }
  0x3a   :  { %359 = vmatprep.mubr.msk.f32.mxu1 %vm79_vm0, %v62_v4  ;;  %372 = vmatprep.subr.bf16.mxu0 %v371_v3  ;;  %v57_v9 = vld [vmem:[#allocation2 + $0x18] sm:$0xff]  ;;  %v58_v11 = vld [vmem:[#allocation2 + $0x20] sm:$0xff]  ;;  %v59_v13 = vld [vmem:[#allocation2 + $0x28] sm:$0xff]  ;;  %s449_s23 = scalar_lea.vmem %s296_s22, 2048  ;;  %p454_p11 = scmp.lt.s32.totalorder %s296_s22, %s296_s22 }
  0x3b   :  { %375 = vmatprep.subr.bf16.mxu1 %v371_v3  ;;  %374 = vmatpush3.bf16.msra.mxu0 %v371_v3  ;;  %v65_v10 = vld [vmem:[#allocation2 + $0x58] sm:$0xff]  ;;  %v66_v12 = vld [vmem:[#allocation2 + $0x60] sm:$0xff]  ;;  %v67_v14 = vld [vmem:[#allocation2 + $0x68] sm:$0xff]  ;;  %p450_p10 = scmp.ne.s32.totalorder %s296_s22, %s449_s23  ;;  %p455_p12 = scmp.lt.s32.totalorder %s449_s23, %s449_s23 }
  0x3c   :  { %376 = vmatpush3.bf16.msra.mxu1 %v371_v3  ;;  %v60_v15 = vld [vmem:[#allocation2 + $0x30] sm:$0xff]  ;;  %v61_v17 = vld [vmem:[#allocation2 + $0x38] sm:$0xff] }
  0x3d   :  { %v68_v16 = vld [vmem:[#allocation2 + $0x70] sm:$0xff]  ;;  %v69_v18 = vld [vmem:[#allocation2 + $0x78] sm:$0xff]  ;;  %p456_p13 = por %p455_p12, %p454_p11 }
  0x3e   :  { %348 = vmatmul.mubr.msk.f32.vlgmr.msra.gmra.mrb[0].mxu0 %vm79_vm0, %v55_v5  ;;  %v308_v19 = vld [vmem:[#allocation7] ss:$0 sm:$0xff] }
  0x3f   :  { %360 = vmatmul.mubr.msk.f32.vlgmr.msra.gmra.mrb[0].mxu1 %vm79_vm0, %v63_v6  ;;  %350 = vmatprep.mubr.msk.f32.mxu0 %vm79_vm0, %v56_v7  ;;  %p457_p0 = pnand %p456_p13, %p450_p10 }
  0x40   :  { %362 = vmatprep.mubr.msk.f32.mxu1 %vm79_vm0, %v64_v8 }
  0x42   :  { %351 = vmatmul.mubr.msk.f32.gmra.mrb[2].mxu0 %vm79_vm0, %v57_v9 }
  0x43   :  { %363 = vmatmul.mubr.msk.f32.gmra.mrb[2].mxu1 %vm79_vm0, %v65_v10  ;;  %353 = vmatprep.mubr.msk.f32.mxu0 %vm79_vm0, %v58_v11 }
  0x44   :  { %365 = vmatprep.mubr.msk.f32.mxu1 %vm79_vm0, %v66_v12 }
  0x46   :  { %354 = vmatmul.mubr.msk.f32.gmra.mrb[4].mxu0 %vm79_vm0, %v59_v13 }
  0x47   :  { %366 = vmatmul.mubr.msk.f32.gmra.mrb[4].mxu1 %vm79_vm0, %v67_v14  ;;  %356 = vmatprep.mubr.msk.f32.mxu0 %vm79_vm0, %v60_v15 }
  0x48   :  { %368 = vmatprep.mubr.msk.f32.mxu1 %vm79_vm0, %v68_v16 }
  0x4a   :  { %357 = vmatmul.mubr.msk.f32.gmra.mrb[6].mxu0 %vm79_vm0, %v61_v17 }
  0x4b   :  { %369 = vmatmul.mubr.msk.f32.gmra.mrb[6].mxu1 %vm79_vm0, %v69_v18 }
 0x111   :  { %v349_v20 = vpop.f32.mrb[0].mxu0 }
 0x112   :  { %v361_v21 = vpop.f32.mrb[0].mxu1  ;;  %v200_v22 = vadd.f32 %v349_v20, %v308_v19  ;;  %v194_v24 = vpop.f32.mrb[1].mxu0 }
 0x113   :  { %v240_v23 = vadd.f32 %v361_v21, %v308_v19  ;;  %v234_v25 = vpop.f32.mrb[1].mxu1  ;;  %v195_v26 = vadd.f32 %v308_v19, %v194_v24 }
 0x114   :  { %v235_v27 = vadd.f32 %v308_v19, %v234_v25  ;;  %275 = vst.msk [vmem:[#allocation8 + $0x8] sm:$0xff] %vm273_vm1, %v200_v22 }
 0x115   :  { %283 = vst.msk [vmem:[#allocation8 + $0x48] sm:$0xff] %vm273_vm1, %v240_v23  ;;  %274 = vst.msk [vmem:[#allocation8] sm:$0xff] %vm273_vm1, %v195_v26  ;;  %v352_v28 = vpop.f32.mrb[2].mxu0 }
 0x116   :  { %282 = vst.msk [vmem:[#allocation8 + $0x40] sm:$0xff] %vm273_vm1, %v235_v27  ;;  %v364_v29 = vpop.f32.mrb[2].mxu1  ;;  %v210_v30 = vadd.f32 %v352_v28, %v308_v19  ;;  %v204_v32 = vpop.f32.mrb[3].mxu0 }
 0x117   :  { %v250_v31 = vadd.f32 %v364_v29, %v308_v19  ;;  %v244_v33 = vpop.f32.mrb[3].mxu1  ;;  %v205_v34 = vadd.f32 %v308_v19, %v204_v32 }
 0x118   :  { %v245_v35 = vadd.f32 %v308_v19, %v244_v33  ;;  %277 = vst.msk [vmem:[#allocation8 + $0x18] sm:$0xff] %vm273_vm1, %v210_v30 }
 0x119   :  { %285 = vst.msk [vmem:[#allocation8 + $0x58] sm:$0xff] %vm273_vm1, %v250_v31  ;;  %276 = vst.msk [vmem:[#allocation8 + $0x10] sm:$0xff] %vm273_vm1, %v205_v34  ;;  %v355_v36 = vpop.f32.mrb[4].mxu0 }
 0x11a   :  { %284 = vst.msk [vmem:[#allocation8 + $0x50] sm:$0xff] %vm273_vm1, %v245_v35  ;;  %v367_v37 = vpop.f32.mrb[4].mxu1  ;;  %v220_v38 = vadd.f32 %v355_v36, %v308_v19  ;;  %v214_v40 = vpop.f32.mrb[5].mxu0 }
 0x11b   :  { %v260_v39 = vadd.f32 %v367_v37, %v308_v19  ;;  %v254_v41 = vpop.f32.mrb[5].mxu1  ;;  %v215_v42 = vadd.f32 %v308_v19, %v214_v40 }
 0x11c   :  { %v255_v43 = vadd.f32 %v308_v19, %v254_v41  ;;  %279 = vst.msk [vmem:[#allocation8 + $0x28] sm:$0xff] %vm273_vm1, %v220_v38 }
 0x11d   :  { %287 = vst.msk [vmem:[#allocation8 + $0x68] sm:$0xff] %vm273_vm1, %v260_v39  ;;  %278 = vst.msk [vmem:[#allocation8 + $0x20] sm:$0xff] %vm273_vm1, %v215_v42  ;;  %v358_v44 = vpop.f32.mrb[6].mxu0 }
 0x11e   :  { %286 = vst.msk [vmem:[#allocation8 + $0x60] sm:$0xff] %vm273_vm1, %v255_v43  ;;  %v370_v45 = vpop.f32.mrb[6].mxu1  ;;  %v230_v46 = vadd.f32 %v358_v44, %v308_v19  ;;  %v224_v48 = vpop.f32.mrb[7].mxu0 }
 0x11f   :  { %v270_v47 = vadd.f32 %v370_v45, %v308_v19  ;;  %v264_v49 = vpop.f32.mrb[7].mxu1  ;;  %v225_v50 = vadd.f32 %v308_v19, %v224_v48 }
 0x120   :  { %v265_v51 = vadd.f32 %v308_v19, %v264_v49  ;;  %281 = vst.msk [vmem:[#allocation8 + $0x38] sm:$0xff] %vm273_vm1, %v230_v46 }
 0x121   :  { %289 = vst.msk [vmem:[#allocation8 + $0x78] sm:$0xff] %vm273_vm1, %v270_v47  ;;  %280 = vst.msk [vmem:[#allocation8 + $0x30] sm:$0xff] %vm273_vm1, %v225_v50 }
 0x122   :  { %288 = vst.msk [vmem:[#allocation8 + $0x70] sm:$0xff] %vm273_vm1, %v265_v51 }
 0x123   :  { %460 = shalt.err (!%p457_p0)
}
 0x124   :  { %s461_s28 = scalar_lea.hbm %s602_s3, 2048 }
 0x125   :  { %p462_p1 = scmp.ne.s32.totalorder %s602_s3, %s461_s28  ;;  %p465_p2 = scmp.lt.u32.totalorder %s461_s28, %s602_s3 }
 0x127   :  { %p467_p3 = pnand %p465_p2, %p462_p1 }
 0x129   :  { %470 = shalt.err (!%p467_p3)
}
 0x12a   :  { %301 = dma.vmem_to_hbm [thread:$0]  %s296_s22, 2048, %s602_s3, [#allocation4], %s479_s24, %s479_s24, %s480_s25  }
 0x12b   :  { %475 = dma.done.wait [#allocation4], 2048  }
 0x12c   :  { %476 = vsyncadd [#allocation4], 4294965248 }
 0x12d   :  { %305 = vsyncpa [#allocation3], 1 }
 0x12e   :  { %306 = vsyncpa [#allocation6], 1 }
 0x12f   :  { %307 = vsyncpa [#allocation4], 1 }

</bundles_post_ra>
